<compile_context>
chip_gen: v6e
topology: v6e:2x2x1
jax: 0.10.0
libtpu: 0.0.40
codegen_flags: <defaults>
</compile_context>

<pallas_src>
import jax
import jax.numpy as jnp
from jax import lax
from jax.experimental import pallas as pl
from jax.experimental.pallas import tpu as pltpu


def _vmem_capacity_bytes():
    """Per-TensorCore VMEM capacity; conservative fallback if unqueryable."""
    try:
        cap = getattr(pltpu.get_tpu_info(), "vmem_capacity_bytes", None)
        if cap:
            return int(cap)
    except Exception:
        pass
    return 64 * 1024 * 1024  # v7x per-TC size: safe lower bound for all gens


def _choose_tiling(N, C, OC, HW, itemsize, vmem_cap):
    """Pick (nb, tp): batch block and pixel tile for the (N, C, HW) view."""
    budget = vmem_cap // 2                        # double-buffered x + out tiles
    col_bytes = (C + OC) * itemsize               # one pixel column (x + out)
    max_pixels = max(128, budget // (2 * col_bytes))

    if HW > max_pixels:
        # Large feature maps: tile the pixel (lane) axis, one image per step.
        nb = 1
        tp = max(128, (max_pixels // 128) * 128)
    else:
        # Small feature maps: whole pixel row per channel fits -> block the
        # batch axis so each input DMA is one contiguous (nb, C, HW) slab.
        tp = HW
        nb = max(1, min(N, max_pixels // max(HW, 1), 8))

    # Keep >= 2 grid steps whenever the problem is splittable so both v7x
    # TensorCores get work ("parallel" grid axes).
    if pl.cdiv(N, nb) * pl.cdiv(HW, tp) < 2:
        if N >= 2:
            nb = pl.cdiv(N, 2)
        elif HW >= 256:
            tp = max(128, pl.cdiv(pl.cdiv(HW, 2), 128) * 128)

    # Load balance: shrink blocks to the minimum that keeps the step count.
    nb = pl.cdiv(N, pl.cdiv(N, nb))
    if tp % 128 == 0 and tp < HW:
        tp = min(tp, pl.cdiv(pl.cdiv(HW, pl.cdiv(HW, tp)), 128) * 128)
    return int(nb), int(tp)


def csm_kernel(x_ref, w_ref, b_ref, o_ref):
    # x_ref: (NB, C, TP)  w_ref: (OC, C)  b_ref: (OC, 1)  o_ref: (NB, OC, TP)
    w = w_ref[...]
    b = b_ref[...]
    # NB is a small static block; unroll so each iteration is one lane-dense
    # (OC, C) @ (C, TP) MXU matmul + bias add + lane-dense store.
    for i in range(x_ref.shape[0]):
        acc = jnp.dot(w, x_ref[i], preferred_element_type=jnp.float32)
        o_ref[i] = (acc + b).astype(o_ref.dtype)


def csm_forward(x, conv_w, conv_b):
    """x: (N, C, H, W), conv_w: (OC, C//4, 2, 2), conv_b: (OC,)."""
    N, C, H, W = x.shape
    OC = conv_w.shape[0]
    HW = H * W
    itemsize = jnp.dtype(x.dtype).itemsize

    # Fold pixelshuffle(2) + conv(k=2, s=2) into one channel-mixing matrix.
    # Row-major reshape gives Wf[oc, c*4 + i*2 + j] = conv_w[oc, c, i, j].
    w_mat = conv_w.reshape(OC, C).astype(x.dtype)
    b_mat = conv_b.reshape(OC, 1).astype(x.dtype)

    # Native-layout view: NCHW -> (N, C, H*W).  Free reshape, no transpose,
    # no padding pass (partial edge blocks handled by Pallas masking).
    x_ncp = x.reshape(N, C, HW)

    vmem_cap = _vmem_capacity_bytes()
    nb, tp = _choose_tiling(N, C, OC, HW, itemsize, vmem_cap)
    grid = (pl.cdiv(N, nb), pl.cdiv(HW, tp))

    # VMEM: double-buffered x/out tiles + resident weights + compiler slack,
    # capped at 75% of the real per-TC capacity (48 MiB on v7x).
    tile_bytes = nb * (C + OC) * tp * itemsize
    weight_bytes = (OC * C + OC) * itemsize
    vmem_needed = 2 * (tile_bytes + weight_bytes) + (2 << 20)
    vmem_limit = int(min(max(vmem_needed, 16 << 20), (vmem_cap * 3) // 4))

    cost = pl.CostEstimate(
        flops=2 * N * HW * C * OC,
        transcendentals=0,
        bytes_accessed=itemsize * (N * HW * (C + OC) + C * OC + OC),
    )

    out_ncp = pl.pallas_call(
        csm_kernel,
        out_shape=jax.ShapeDtypeStruct((N, OC, HW), x.dtype),
        grid_spec=pltpu.PrefetchScalarGridSpec(
            num_scalar_prefetch=0,
            grid=grid,
            in_specs=[
                pl.BlockSpec((nb, C, tp), lambda n, p: (n, 0, p)),  # x tile
                pl.BlockSpec((OC, C), lambda n, p: (0, 0)),         # weights, resident
                pl.BlockSpec((OC, 1), lambda n, p: (0, 0)),         # bias, resident
            ],
            out_specs=pl.BlockSpec((nb, OC, tp), lambda n, p: (n, 0, p)),
        ),
        compiler_params=pltpu.CompilerParams(
            dimension_semantics=("parallel", "parallel"),
            vmem_limit_bytes=vmem_limit,
        ),
        cost_estimate=cost,
    )(x_ncp, w_mat, b_mat)

    # (N, OC, HW) -> NCHW: free row-major reshape.
    return out_ncp.reshape(N, OC, H, W)


def csm_reference(x, conv_w, conv_b):
    """Literal pixelshuffle(2) + conv2d(k=2, s=2) in plain JAX for checking."""
    N, C, H, W = x.shape
    OC = conv_w.shape[0]
    r = 2
    xs = x.reshape(N, C // (r * r), r, r, H, W)
    xs = xs.transpose(0, 1, 4, 2, 5, 3).reshape(N, C // (r * r), H * r, W * r)
    out = lax.conv_general_dilated(
        xs, conv_w, window_strides=(2, 2), padding="VALID",
        dimension_numbers=("NCHW", "OIHW", "NCHW"))
    return out + conv_b.reshape(1, OC, 1, 1)


if __name__ == "__main__":
    key = jax.random.PRNGKey(0)
    k1, k2, k3 = jax.random.split(key, 3)

    # Small shapes consistent with the module (in_channel divisible by 4).
    N, Cin, H, W = 2, 16, 16, 16
    OC = 8

    x = jax.random.normal(k1, (N, Cin, H, W), dtype=jnp.float32)
    conv_w = 0.1 * jax.random.normal(k2, (OC, Cin // 4, 2, 2), dtype=jnp.float32)
    conv_b = 0.1 * jax.random.normal(k3, (OC,), dtype=jnp.float32)

    out = jax.block_until_ready(csm_forward(x, conv_w, conv_b))
    ref = jax.block_until_ready(csm_reference(x, conv_w, conv_b))

    assert out.shape == (N, OC, H, W), out.shape
    assert jnp.allclose(out, ref, atol=1e-4, rtol=1e-4), "mismatch vs reference"
    print("KERNEL_OK")
</pallas_src>

<mosaic_0001>
module attributes {stable_mosaic.version = 11 : i64} {
  func.func @csm_kernel(%arg0: i32, %arg1: i32, %arg2: memref<1x16x256xf32, #tpu.memory_space<vmem>>, %arg3: memref<8x16xf32, #tpu.memory_space<vmem>>, %arg4: memref<8x1xf32, #tpu.memory_space<vmem>>, %arg5: memref<1x8x256xf32, #tpu.memory_space<vmem>>) attributes {dimension_semantics = [#tpu.dimension_semantics<parallel>, #tpu.dimension_semantics<parallel>], iteration_bounds = array<i64: 2, 1>, scalar_prefetch = 0 : i64, scratch_operands = 0 : i64, tpu.core_type = #tpu.core_type<tc>, window_params = [{transform_indices = @transform_0, window_bounds = array<i64: 1, 16, 256>}, {pipeline_mode = #tpu.pipeline_mode<synchronous>, transform_indices = @transform_1, window_bounds = array<i64: 8, 16>}, {pipeline_mode = #tpu.pipeline_mode<synchronous>, transform_indices = @transform_2, window_bounds = array<i64: 8, 1>}, {transform_indices = @transform_3, window_bounds = array<i64: 1, 8, 256>}]} {
    %c0 = arith.constant 0 : index
    %c0_0 = arith.constant 0 : index
    %0 = vector.load %arg3[%c0, %c0_0] : memref<8x16xf32, #tpu.memory_space<vmem>>, vector<8x16xf32>
    %c0_1 = arith.constant 0 : index
    %c0_2 = arith.constant 0 : index
    %1 = vector.load %arg4[%c0_1, %c0_2] : memref<8x1xf32, #tpu.memory_space<vmem>>, vector<8x1xf32>
    %c0_3 = arith.constant 0 : index
    %c0_4 = arith.constant 0 : index
    %c0_5 = arith.constant 0 : index
    %2 = vector.load %arg2[%c0_3, %c0_4, %c0_5] : memref<1x16x256xf32, #tpu.memory_space<vmem>>, vector<1x16x256xf32>
    %3 = vector.shape_cast %2 : vector<1x16x256xf32> to vector<16x256xf32>
    %cst = arith.constant dense<0.000000e+00> : vector<8x256xf32>
    %4 = tpu.matmul %0, %3, %cst {dimension_numbers = #tpu.dot_dimension_numbers<[1], [0], [0], [1], [0, 0, 1, 1], [], []>} : vector<8x16xf32>, vector<16x256xf32>, vector<8x256xf32> -> vector<8x256xf32>
    %5 = vector.broadcast %1 : vector<8x1xf32> to vector<8x256xf32>
    %6 = arith.addf %4, %5 : vector<8x256xf32>
    %c0_6 = arith.constant 0 : index
    %c0_7 = arith.constant 0 : index
    %c0_8 = arith.constant 0 : index
    %7 = vector.load %arg5[%c0_6, %c0_7, %c0_8] : memref<1x8x256xf32, #tpu.memory_space<vmem>>, vector<1x8x256xf32>
    %8 = vector.shape_cast %7 : vector<1x8x256xf32> to vector<8x256xf32>
    %9 = vector.shape_cast %6 : vector<8x256xf32> to vector<1x8x256xf32>
    tpu.vector_store %arg5[%c0_6, %c0_7, %c0_8], %9 {strides = array<i32>} : memref<1x8x256xf32, #tpu.memory_space<vmem>>, vector<1x8x256xf32>,
    return
  }
  func.func @transform_0(%arg0: i32, %arg1: i32) -> (i32, i32, i32) {
    %c0_i32 = arith.constant 0 : i32
    %c0_i32_0 = arith.constant 0 : i32
    return %arg0, %c0_i32, %arg1 : i32, i32, i32
  }
  func.func @transform_1(%arg0: i32, %arg1: i32) -> (i32, i32) {
    %c0_i32 = arith.constant 0 : i32
    %c0_i32_0 = arith.constant 0 : i32
    %c0_i32_1 = arith.constant 0 : i32
    return %c0_i32, %c0_i32_0 : i32, i32
  }
  func.func @transform_2(%arg0: i32, %arg1: i32) -> (i32, i32) {
    %c0_i32 = arith.constant 0 : i32
    %c0_i32_0 = arith.constant 0 : i32
    %c0_i32_1 = arith.constant 0 : i32
    return %c0_i32, %c0_i32_0 : i32, i32
  }
  func.func @transform_3(%arg0: i32, %arg1: i32) -> (i32, i32, i32) {
    %c0_i32 = arith.constant 0 : i32
    %c0_i32_0 = arith.constant 0 : i32
    return %arg0, %c0_i32, %arg1 : i32, i32, i32
  }
}

</mosaic_0001>

<bundles_post_ra>
// kernel: tpu_custom_call.1
= control target key start
LH: loop header
LB: loop body
LE: loop exit
PB: predicated region body
PF: predicated region fallthrough
CT: control target
= control target key end

     0   :  { %8 = vsyncpa [#allocation3], 0  ;;  %s758_s0 = inlined_call_operand.hbm [shape: f32[2,16,256], index: 0, kind: input, shape index: {}]   ;;  %s759_s1 = inlined_call_operand.vmem [shape: f32[8,16], index: 1, kind: input, shape index: {}]   ;;  %s760_s2 = inlined_call_operand.vmem [shape: f32[8,1], index: 2, kind: input, shape index: {}]   ;;  %s761_s3 = inlined_call_operand.hbm [shape: f32[2,8,256], index: 3, kind: output, shape index: {}]  }
   0x1   :  { %10 = vsyncpa [#allocation3 + $0x1], 0 }
   0x2   :  { %11 = vsyncpa [#allocation4], 0 }
   0x3   :  { %13 = vsyncpa [#allocation4 + $0x1], 0  ;;  %s619_s12 = smov 0   ;;  %s621_s13 = smov 0  }
   0x4   :  { %s623_s14 = smov 0   ;;  %s625_s15 = smov 0  }
   0x5   :  { %s627_s16 = smov 0   ;;  %s629_s17 = smov 0  }
   0x6 LB: > { %s398_s18 = sadd.s32 4294967295, %s591_s17   ;;  %s399_s19 = sadd.s32 4294967294, %s591_s17   ;;  %s591_s17 = sphi %s629_s17, %s19_s17   ;;  %s587_s16 = sphi %s627_s16, %s772_s16   ;;  %s583_s15 = sphi %s625_s15, %s771_s15   ;;  %s579_s14 = sphi %s623_s14, %s770_s14   ;;  %s575_s13 = sphi %s621_s13, %s769_s13   ;;  %s571_s12 = sphi %s619_s12, %s768_s12  }
   0x7   : > { %s31_s20 = sadd.s32 1, %s587_s16  ;;  %s40_s21 = sadd.s32 1, %s579_s14 }
   0x8   : > { %p33_p0 = scmp.ge.s32.totalorder %s31_s20, 2  ;;  %p47_p1 = scmp.ne.s32.totalorder %s579_s14, %s575_s13 }
   0x9   : > { %p48_p2 = scmp.eq.s32.totalorder %s591_s17, 0  ;;  %p53_p3 = scmp.ne.s32.totalorder %s575_s13, %s571_s12 }
   0xa   : > { %s774_s20 = smov (%p33_p0, %s31_s20), 0  ;;  %p54_p5 = scmp.eq.s32.totalorder %s398_s18, 0 }
   0xb   : > { %p660_p4 = por %p48_p2, %p47_p1  ;;  %s35_s23 = ssub.s32 %s587_s16, %s774_s20 }
   0xc   : > { %p121_p6 = scmp.eq.s32.totalorder %s398_s18, 1  ;;  %p38_p7 = scmp.eq.s32.totalorder %s35_s23, 0 }
   0xd   : > { %p666_p8 = por %p54_p5, %p53_p3  ;;  %p127_p10 = scmp.eq.s32.totalorder %s399_s19, 1 }
   0xe   : > { %p670_p9 = por %p121_p6, %p47_p1  ;;  %p428_p13 = scmp.lt.s32.totalorder %s591_s17, 2 }
   0xf   : > { %s675_s26 = scalar_select %p38_p7, %s579_s14, %s40_s21  }
  0x10   : > { %p677_p11 = por %p127_p10, %p53_p3  ;;  %s153_s28 = sand.u32 1, %s579_s14  }
  0x11   : > { %s402_s29 = sshll.u32 %s153_s28, 5  ;;  %s414_s30 = sshll.u32 %s587_s16, 9 }
  0x12   : > { %s165_s6 = scalar_lea.hbm %s758_s0, %s414_s30  ;;  %s157_s7 = scalar_lea.vmem [#allocation2], %s402_s29 }
  0x13   : > { %s166_s8 = sshll.u32 %s157_s7, 4  ;;  %p690_p0 = pnand %p428_p13, %p660_p4  ;;  %s167_s8 = int_to_ptr.vmem [resolvable:$true] %s166_s8 }
  0x14   : > { %p405_p1 = scmp.ge.s32.totalorder %s591_s17, 1  ;;  %s154_s10 = scalar_lea.sflag [#allocation3], %s153_s28 }
  0x15   : > { %p485_p2 = pneg %p690_p0  ;;  %s496_s11 = scalar_lea.vmem %s167_s8, 512 }
  0x16   : > { %p497_p3 = scmp.ne.s32.totalorder %s167_s8, %s496_s11  ;;  %s593_s18 = smov [#allocation2]  }
  0x17   : > { %s501_s19 = sshll.u32 %s593_s18, 4  ;;  %s502_s19 = int_to_ptr.vmem [resolvable:$false] %s501_s19 }
  0x18   : > { %p499_p5 = pnand %p497_p3, %p485_p2  ;;  %s503_s21 = scalar_lea.vmem %s502_s19, 1024 }
  0x19   : > { %p504_p7 = scmp.lt.s32.totalorder %s167_s8, %s502_s19  ;;  %p505_p10 = scmp.lt.s32.totalorder %s503_s21, %s496_s11 }
  0x1a   : > { %p500_p6 = pneg %p499_p5 }
  0x1b   : > { %p506_p12 = por %p505_p10, %p504_p7 }
  0x1d   : > { %p507_p4 = pnand %p506_p12, %p500_p6 }
  0x1f   : > { %510 = shalt.err (!%p507_p4)
}
  0x20   : > { %s594_s22 = smov 256   ;;  %s595_s23 = smov 16  }
  0x21   : > { %423 = dma.hbm_to_vmem [thread:$0]  (!%p690_p0), %s165_s6, 512, %s167_s8, %s154_s10, %s594_s22, %s594_s22, %s595_s23  }
  0x22   : > { %p174_p13 = scmp.lt.s32.totalorder %s591_s17, 3 }
  0x24   : > { %p175_p2 = pnand %p405_p1, %p174_p13 }
  0x25   : > { %s703_s28 = sand.u32 (!%p175_p2), 1, %s575_s13  }
  0x26   : > { %178 = sbr.rel (%p175_p2) target bundleno = 260 (0x104), region = 32  ;;  %s406_s29 = sshll.u32 (!%p175_p2), %s703_s28, 5 }
  0x27   : > { %s181_s30 = scalar_lea.sflag (!%p175_p2), [#allocation3], %s703_s28  ;;  %s184_s4 = scalar_lea.vmem (!%p175_p2), [#allocation2], %s406_s29 }
  0x2b   : > { %562 = dma.done.wait (%p666_p8), %s181_s30, 512  }
  0x2c   : > { %564 = vsyncadd (%p666_p8), %s181_s30, 4294966784  ;;  %v596_v0 = vmov 0.0   ;;  %v597_v1 = vmov 0   ;;  %v214_v2 = vld [vmem:[%s184_s4 + $0x18] sm:$0xff]  ;;  %v213_v3 = vld [vmem:[%s184_s4 + $0x10] sm:$0xff]  ;;  %vm220_vm0 = vcmask 130048  }
  0x2d   : > { %288 = vmatprep.mubr.f32.mxu0 %v596_v0  ;;  %482 = vset.pattern.permute.xlu0 %v597_v1  ;;  %v212_v4 = vld [vmem:[%s184_s4 + $0x8] sm:$0xff]  ;;  %v211_v5 = vld [vmem:[%s184_s4] sm:$0xff]  ;;  %s407_s24 = sshll.u32 %s703_s28, 4  ;;  %s415_s9 = sshll.u32 %s583_s15, 8 }
  0x2e   : > { %252 = vmatprep.subr.mxu0 %v214_v2  ;;  %v210_v6 = vld [vmem:[%s760_s2] sm:$0xff]  ;;  %s206_s10 = scalar_lea.vmem [#allocation5], %s407_s24  ;;  %s312_s21 = scalar_lea.hbm %s761_s3, %s415_s9 }
  0x2f   : > { %253 = vmatpush1.msra.mxu0 %v213_v3  ;;  %v209_v7 = vld [vmem:[%s759_s1] sm:$0xff]  ;;  %217 = vperm.xlu0 %482, %v210_v6   ;;  %s314_s11 = sshll.u32 %s206_s10, 4  ;;  %s298_s22 = scalar_lea.sflag [#allocation4], %s703_s28  ;;  %s315_s11 = int_to_ptr.vmem [resolvable:$true] %s314_s11 }
  0x30   : > { %254 = vmatprep.subr.mxu0 %v212_v4  ;;  %s511_s23 = scalar_lea.vmem %s315_s11, 256  ;;  %s598_s29 = smov [#allocation5]  }
  0x31   : > { %255 = vmatpush1.msra.mxu0 %v211_v5  ;;  %p512_p8 = scmp.ne.s32.totalorder %s315_s11, %s511_s23  ;;  %s515_s15 = sshll.u32 %s598_s29, 4  ;;  %s516_s15 = int_to_ptr.vmem [resolvable:$false] %s515_s15 }
  0x32   : > { %408 = vmatmul.mubr.msk.f32.vlgmr.msra.gmra.mxu0 %vm220_vm0, %v209_v7  ;;  %s517_s30 = scalar_lea.vmem %s516_s15, 512  ;;  %p518_p1 = scmp.lt.s32.totalorder %s315_s11, %s516_s15 }
  0x33   : > { %p513_p12 = pnand %p512_p8, %p670_p9  ;;  %p519_p3 = scmp.lt.s32.totalorder %s517_s30, %s511_s23 }
  0x35   : > { %p514_p0 = pneg %p513_p12  ;;  %p520_p5 = por %p519_p3, %p518_p1 }
  0x37   : > { %p521_p6 = pnand %p520_p5, %p514_p0 }
  0xaa   : > { %v218_v8 = vpop.permute.xlu0 %217 }
  0xf2   : > { %v290_v9 = vpop.f32.mrf.mxu0 }
  0xf3   : > { %v291_v10 = vadd.f32 %v290_v9, %v218_v8 }
  0xf4   : > { %v292_v11 = vpop.f32.mrf.mxu0 }
  0xf5   : > { %295 = vst [vmem:[%s206_s10] sm:$0xff] %v291_v10  ;;  %v293_v12 = vadd.f32 %v292_v11, %v218_v8 }
  0xf7   : > { %296 = vst [vmem:[%s206_s10 + $0x8] sm:$0xff] %v293_v12 }
  0xf8   : > { %524 = shalt.err (!%p521_p6)
}
  0xf9   : > { %s525_s4 = scalar_lea.hbm %s312_s21, 256  ;;  %s529_s6 = scalar_lea.hbm %s761_s3, 512 }
  0xfa   : > { %p526_p7 = scmp.ne.s32.totalorder %s312_s21, %s525_s4  ;;  %p530_p13 = scmp.lt.s32.totalorder %s312_s21, %s761_s3 }
  0xfb   : > { %p531_p2 = scmp.lt.s32.totalorder %s529_s6, %s525_s4 }
  0xfc   : > { %p527_p10 = pnand %p526_p7, %p670_p9 }
  0xfd   : > { %p532_p8 = por %p531_p2, %p530_p13 }
  0xfe   : > { %p528_p4 = pneg %p527_p10 }
 0x100   : > { %p533_p12 = pnand %p532_p8, %p528_p4 }
 0x102   : > { %536 = shalt.err (!%p533_p12)
}
 0x103   : > { %418 = dma.vmem_to_hbm [thread:$0]  (%p670_p9), %s315_s11, 256, %s312_s21, %s298_s22  }
 0x104 PF: > { %s326_s24 = sand.u32 1, %s571_s12   ;;  %p767_p0 = scmp.ge.s32.totalorder %s591_s17, 2 }
 0x105   : > { %s327_s9 = scalar_lea.sflag [#allocation4], %s326_s24 }
 0x106   : > { %p425_p1 = pnand %p767_p0, %p677_p11 }
 0x108   : > { %p426_p3 = pneg %p425_p1 }
 0x10a   : > { %566 = dma.done.wait (%p426_p3), %s327_s9, 256  }
 0x10b   : > { %568 = vsyncadd (%p426_p3), %s327_s9, 4294967040  ;;  %s19_s17 = sadd.s32 1, %s591_s17   ;;  %s768_s12 = smov %s575_s13 }
 0x10c   : > { %p16_p5 = scmp.ge.s32.totalorder %s19_s17, 4   ;;  %s769_s13 = smov %s579_s14 }
 0x10d   : > { %s770_s14 = smov %s675_s26  ;;  %s771_s15 = smov %s587_s16 }
 0x10e   : > { %s772_s16 = smov %s774_s20  ;;  %18 = sbr.rel (!%p16_p5) target bundleno = 6 (0x6), region = 77 }
 0x113   :  { %332 = vsyncpa [#allocation3], 1 }
 0x114   :  { %334 = vsyncpa [#allocation3 + $0x1], 1 }
 0x115   :  { %335 = vsyncpa [#allocation4], 1 }
 0x116   :  { %337 = vsyncpa [#allocation4 + $0x1], 1 }

</bundles_post_ra>
